<compile_context>
chip_gen: v7x
topology: tpu7x:2x2x1
jax: 0.10.0
libtpu: 0.0.40
codegen_flags: <defaults>
</compile_context>

<pallas_src>
import functools

import jax
import jax.numpy as jnp
from jax import lax
from jax.experimental import pallas as pl
from jax.experimental.pallas import tpu as pltpu


def _gmm_forward_kernel(x_ref, quad_rhs_ref, lin_rhs_ref, bias_ref, o_ref):
    # x tile: (TN, D); quad_rhs/lin_rhs: (K, D); bias: (K, 1); output: (1, TN)
    x = x_ref[...].astype(jnp.float32)

    # A @ B.T pattern (contraction on the last dim of both operands) -> (K, TN)
    dn = (((1,), (1,)), ((), ()))
    quad = lax.dot_general(quad_rhs_ref[...], x * x, dn,
                           preferred_element_type=jnp.float32)   # sum_d -0.5*x^2/var
    cross = lax.dot_general(lin_rhs_ref[...], x, dn,
                            preferred_element_type=jnp.float32)  # sum_d x*mu/var

    # log_prob[k, n] = log(mix_k) + const_k + quad[k, n] + cross[k, n]
    log_prob = quad + cross + bias_ref[...]                      # (K, TN)

    # logsumexp over the component (sublane) axis -> lane-dense (1, TN) output row.
    m = jnp.max(log_prob, axis=0, keepdims=True)
    s = jnp.sum(jnp.exp(log_prob - m), axis=0, keepdims=True)
    o_ref[...] = m + jnp.log(s)


def _round_up(a, b):
    return -(-a // b) * b


@functools.partial(jax.jit, static_argnames=("tile_n",))
def mixture_model_forward(x, mean, log_std, mixture_logits, *, tile_n=512):
    """Log-likelihood of each row of x under the Gaussian mixture. Shape (N,)."""
    n, d = x.shape
    k = mean.shape[0]

    # ---- parameter-only math: computed once in the wrapper, not per grid step ----
    mean = mean.astype(jnp.float32)
    log_std = log_std.astype(jnp.float32)
    inv_var = jnp.exp(-2.0 * log_std)                                   # (K, D)
    quad_rhs = -0.5 * inv_var                                           # (K, D)
    lin_rhs = mean * inv_var                                            # (K, D)
    const = jnp.sum(
        -0.5 * jnp.log(2.0 * jnp.pi) - log_std - 0.5 * mean * mean * inv_var,
        axis=-1,
    )                                                                   # (K,)
    # Same semantics as the PyTorch module: torch.log(mixture_logits) added directly.
    bias = (const + jnp.log(mixture_logits.astype(jnp.float32))).reshape(k, 1)

    # ---- row tiling: lane-aligned (multiple of 128) tiles; pad ragged N ----
    tn = max(128, min(_round_up(tile_n, 128), _round_up(n, 128)))
    n_pad = _round_up(n, tn)
    if n_pad != n:
        x = jnp.pad(x, ((0, n_pad - n), (0, 0)))

    out = pl.pallas_call(
        _gmm_forward_kernel,
        out_shape=jax.ShapeDtypeStruct((1, n_pad), jnp.float32),
        grid=(n_pad // tn,),
        in_specs=[
            pl.BlockSpec((tn, d), lambda i: (i, 0)),   # x row tile
            pl.BlockSpec((k, d), lambda i: (0, 0)),    # -0.5 / var   (replicated)
            pl.BlockSpec((k, d), lambda i: (0, 0)),    # mu / var     (replicated)
            pl.BlockSpec((k, 1), lambda i: (0, 0)),    # log(mix) + const
        ],
        out_specs=pl.BlockSpec((1, tn), lambda i: (0, i)),
        compiler_params=pltpu.CompilerParams(
            dimension_semantics=("parallel",),
        ),
    )(x, quad_rhs, lin_rhs, bias)
    return out[0, :n]


def _reference_forward(x, mean, log_std, mixture_logits):
    var = jnp.exp(2.0 * log_std)
    diff = x[:, None, :] - mean[None, :, :]
    comp = -0.5 * jnp.log(2.0 * jnp.pi) - log_std[None] - 0.5 * diff * diff / var[None]
    comp_lp = comp.sum(-1)
    lp = jnp.log(mixture_logits)[None, :] + comp_lp
    return jax.scipy.special.logsumexp(lp, axis=-1)


if __name__ == "__main__":
    n_components = 8
    n_features = 32
    batch = 1000  # deliberately NOT a multiple of the row tile -> exercises padding

    key = jax.random.PRNGKey(0)
    k_x, k_mu, k_ls, k_mix = jax.random.split(key, 4)

    x = jax.random.normal(k_x, (batch, n_features), dtype=jnp.float32)
    mean = jax.random.normal(k_mu, (n_components, n_features), dtype=jnp.float32)
    log_std = 0.1 * jax.random.normal(
        k_ls, (n_components, n_features), dtype=jnp.float32
    )
    # forward() takes log() of mixture_logits directly (module contract), so init > 0.
    mixture_logits = jax.random.uniform(
        k_mix, (n_components,), minval=0.5, maxval=1.5, dtype=jnp.float32
    )

    out = mixture_model_forward(x, mean, log_std, mixture_logits)
    out = jax.block_until_ready(out)

    ref = _reference_forward(x, mean, log_std, mixture_logits)
    assert out.shape == (batch,)
    max_err = float(jnp.max(jnp.abs(out - ref)))
    assert bool(jnp.allclose(out, ref, atol=2e-3, rtol=2e-3)), max_err

    print("KERNEL_OK")
</pallas_src>

<mosaic_0001>
module attributes {stable_mosaic.version = 11 : i64} {
  func.func @_gmm_forward_kernel(%arg0: i32, %arg1: memref<512x32xf32, #tpu.memory_space<vmem>>, %arg2: memref<8x32xf32, #tpu.memory_space<vmem>>, %arg3: memref<8x32xf32, #tpu.memory_space<vmem>>, %arg4: memref<8x1xf32, #tpu.memory_space<vmem>>, %arg5: memref<1x512xf32, #tpu.memory_space<vmem>>) attributes {dimension_semantics = [#tpu.dimension_semantics<parallel>], iteration_bounds = array<i64: 2>, scalar_prefetch = 0 : i64, scratch_operands = 0 : i64, tpu.core_type = #tpu.core_type<tc>, window_params = [{transform_indices = @transform_0, window_bounds = array<i64: 512, 32>}, {pipeline_mode = #tpu.pipeline_mode<synchronous>, transform_indices = @transform_1, window_bounds = array<i64: 8, 32>}, {pipeline_mode = #tpu.pipeline_mode<synchronous>, transform_indices = @transform_2, window_bounds = array<i64: 8, 32>}, {pipeline_mode = #tpu.pipeline_mode<synchronous>, transform_indices = @transform_3, window_bounds = array<i64: 8, 1>}, {transform_indices = @transform_4, window_bounds = array<i64: 1, 512>}]} {
    %c0 = arith.constant 0 : index
    %c0_0 = arith.constant 0 : index
    %0 = vector.load %arg1[%c0, %c0_0] : memref<512x32xf32, #tpu.memory_space<vmem>>, vector<512x32xf32>
    %c0_1 = arith.constant 0 : index
    %c0_2 = arith.constant 0 : index
    %1 = vector.load %arg2[%c0_1, %c0_2] : memref<8x32xf32, #tpu.memory_space<vmem>>, vector<8x32xf32>
    %2 = arith.mulf %0, %0 : vector<512x32xf32>
    %cst = arith.constant dense<0.000000e+00> : vector<8x512xf32>
    %3 = tpu.matmul %1, %2, %cst {dimension_numbers = #tpu.dot_dimension_numbers<[1], [1], [0], [0], [0, 0, 1, 0], [], []>} : vector<8x32xf32>, vector<512x32xf32>, vector<8x512xf32> -> vector<8x512xf32>
    %c0_3 = arith.constant 0 : index
    %c0_4 = arith.constant 0 : index
    %4 = vector.load %arg3[%c0_3, %c0_4] : memref<8x32xf32, #tpu.memory_space<vmem>>, vector<8x32xf32>
    %cst_5 = arith.constant dense<0.000000e+00> : vector<8x512xf32>
    %5 = tpu.matmul %4, %0, %cst_5 {dimension_numbers = #tpu.dot_dimension_numbers<[1], [1], [0], [0], [0, 0, 1, 0], [], []>} : vector<8x32xf32>, vector<512x32xf32>, vector<8x512xf32> -> vector<8x512xf32>
    %6 = arith.addf %3, %5 : vector<8x512xf32>
    %c0_6 = arith.constant 0 : index
    %c0_7 = arith.constant 0 : index
    %7 = vector.load %arg4[%c0_6, %c0_7] : memref<8x1xf32, #tpu.memory_space<vmem>>, vector<8x1xf32>
    %8 = vector.broadcast %7 : vector<8x1xf32> to vector<8x512xf32>
    %9 = arith.addf %6, %8 : vector<8x512xf32>
    %cst_8 = arith.constant dense<0xFF800000> : vector<512xf32>
    %10 = vector.multi_reduction <maximumf>, %9, %cst_8 [0] : vector<8x512xf32> to vector<512xf32>
    %11 = vector.shape_cast %10 : vector<512xf32> to vector<1x512xf32>
    %12 = vector.broadcast %11 : vector<1x512xf32> to vector<8x512xf32>
    %13 = arith.subf %9, %12 : vector<8x512xf32>
    %14 = math.exp %13 : vector<8x512xf32>
    %cst_9 = arith.constant dense<0.000000e+00> : vector<512xf32>
    %15 = vector.multi_reduction <add>, %14, %cst_9 [0] : vector<8x512xf32> to vector<512xf32>
    %16 = vector.shape_cast %15 : vector<512xf32> to vector<1x512xf32>
    %17 = math.log %16 : vector<1x512xf32>
    %18 = arith.addf %11, %17 : vector<1x512xf32>
    %c0_10 = arith.constant 0 : index
    %c0_11 = arith.constant 0 : index
    %19 = vector.load %arg5[%c0_10, %c0_11] : memref<1x512xf32, #tpu.memory_space<vmem>>, vector<1x512xf32>
    tpu.vector_store %arg5[%c0_10, %c0_11], %18 {strides = array<i32>} : memref<1x512xf32, #tpu.memory_space<vmem>>, vector<1x512xf32>,
    return
  }
  func.func @transform_0(%arg0: i32) -> (i32, i32) {
    %c0_i32 = arith.constant 0 : i32
    %c0_i32_0 = arith.constant 0 : i32
    return %arg0, %c0_i32 : i32, i32
  }
  func.func @transform_1(%arg0: i32) -> (i32, i32) {
    %c0_i32 = arith.constant 0 : i32
    %c0_i32_0 = arith.constant 0 : i32
    %c0_i32_1 = arith.constant 0 : i32
    return %c0_i32, %c0_i32_0 : i32, i32
  }
  func.func @transform_2(%arg0: i32) -> (i32, i32) {
    %c0_i32 = arith.constant 0 : i32
    %c0_i32_0 = arith.constant 0 : i32
    %c0_i32_1 = arith.constant 0 : i32
    return %c0_i32, %c0_i32_0 : i32, i32
  }
  func.func @transform_3(%arg0: i32) -> (i32, i32) {
    %c0_i32 = arith.constant 0 : i32
    %c0_i32_0 = arith.constant 0 : i32
    %c0_i32_1 = arith.constant 0 : i32
    return %c0_i32, %c0_i32_0 : i32, i32
  }
  func.func @transform_4(%arg0: i32) -> (i32, i32) {
    %c0_i32 = arith.constant 0 : i32
    %c0_i32_0 = arith.constant 0 : i32
    return %c0_i32, %arg0 : i32, i32
  }
}

</mosaic_0001>

<bundles_post_ra>
// kernel: mixture_model_forward.1
= control target key start
LH: loop header
LB: loop body
LE: loop exit
PB: predicated region body
PF: predicated region fallthrough
CT: control target
= control target key end

     0   :  { %9 = vsyncpa [#allocation3], 0  ;;  %s2473_s0 = inlined_call_operand.vmem [shape: f32[1024,32], index: 0, kind: input, shape index: {}]   ;;  %s2474_s1 = inlined_call_operand.vmem [shape: f32[8,32], index: 1, kind: input, shape index: {}]   ;;  %s2475_s2 = inlined_call_operand.vmem [shape: f32[8,32], index: 2, kind: input, shape index: {}]   ;;  %s2476_s3 = inlined_call_operand.vmem [shape: f32[8,1], index: 3, kind: input, shape index: {}]   ;;  %s2477_s4 = inlined_call_operand.hbm [shape: f32[1,1024], index: 4, kind: output, shape index: {}]  }
   0x1   :  { %11 = vsyncpa [#allocation3 + $0x1], 0  ;;  %s1821_s15 = smov 0   ;;  %s1823_s16 = smov 0  }
   0x2   :  { %s1825_s17 = smov 0   ;;  %s1827_s18 = smov 0  }
   0x3 LB: > { %s1193_s19 = sadd.s32 4294967295, %s1791_s18   ;;  %s1194_s20 = sadd.s32 4294967294, %s1791_s18   ;;  %s1791_s18 = sphi %s1827_s18, %s2515_s18   ;;  %s1787_s17 = sphi %s1825_s17, %s2514_s17   ;;  %s1783_s16 = sphi %s1823_s16, %s2513_s16   ;;  %s1779_s15 = sphi %s1821_s15, %s2512_s15  }
   0x4   : > { %s1844_s21 = sadd.s32 1, %s1791_s18   ;;  %s113_s22 = sadd.s32 1, %s1787_s17 }
   0x5   : > { %s110_s23 = ssub.s32 %s1791_s18, %s1844_s21  ;;  %p123_p0 = scmp.ne.s32.totalorder %s1787_s17, %s1783_s16 }
   0x6   : > { %p111_p1 = scmp.eq.s32.totalorder %s110_s23, 0  ;;  %p124_p2 = scmp.eq.s32.totalorder %s1193_s19, 1 }
   0x7   : > { %p129_p3 = scmp.ne.s32.totalorder %s1783_s16, %s1779_s15  ;;  %p130_p4 = scmp.eq.s32.totalorder %s1194_s20, 1 }
   0x8   : > { %s1854_s24 = scalar_select %p111_p1, %s1787_s17, %s113_s22  }
   0x9   : > { %p1856_p5 = por %p124_p2, %p123_p0  ;;  %p1860_p6 = por %p130_p4, %p129_p3 }
   0xa   : > { %p1197_p7 = scmp.ge.s32.totalorder %s1791_s18, 1  ;;  %p166_p8 = scmp.lt.s32.totalorder %s1791_s18, 3 }
   0xc   : > { %p167_p9 = pnand %p1197_p7, %p166_p8 }
   0xe   : > { %170 = sbr.rel (%p167_p9) target bundleno = 453 (0x1c5), region = 36 }
  0x15   : > { %s1866_s27 = sshll.u32 %s1193_s19, 6  ;;  %vm329_vm0 = vcmask 261120   ;;  %v1871_v0 = vld [vmem:[%s2475_s2] sm:$0xff]  ;;  %v1793_v28 = vmov 0   ;;  %s189_s13 = sand.u32 1, %s1783_s16  }
  0x16   : > { %p193_p10 = scmp.lt.s32.totalorder %s1866_s27, 127  ;;  %1371 = vmatprep.mubr.msk.f32.mxu0 %vm329_vm0, %v1871_v0  ;;  %1405 = vmatprep.mubr.msk.f32.mxu1 %vm329_vm0, %v1871_v0  ;;  %vm1886_vm1 = vmpackc.low %vm329_vm0, %vm329_vm0  ;;  %v1004_v45 = vld [vmem:[%s2476_s3] sm:$0xff]  ;;  %s1198_s14 = sshll.u32 %s189_s13, 2 }
  0x17   : > { %1712 = vset.pattern.permute.xlu0 %v1793_v28  ;;  %s191_s19 = scalar_lea.vmem [#allocation2], %s1198_s14  ;;  %s2431_s28 = scalar_lea.hbm %s2477_s4, %s1866_s27 }
  0x18   : > { %s194_s30 = scalar_select %p193_p10, %s1866_s27, 127  ;;  %1007 = vperm.xlu0 %1712, %v1004_v45  }
  0x19   : > { %s1135_s20 = sshll.u32 %s191_s19, 4  ;;  %s1121_s29 = scalar_lea.sflag [#allocation3], %s189_s13  ;;  %s2433_s20 = int_to_ptr.vmem [resolvable:$true] %s1135_s20 }
  0x1a   : > { %s1200_s5 = sshll.u32 %s194_s30, 3  ;;  %s1729_s30 = scalar_lea.vmem %s2433_s20, 64 }
  0x1b   : > { %s1882_s8 = scalar_lea.vmem %s2473_s0, %s1200_s5  ;;  %p1730_p11 = scmp.ne.s32.totalorder %s2433_s20, %s1729_s30 }
  0x1c   : > { %v1891_v2 = vld [vmem:[%s1882_s8 + $0x80] sm:$0xff]  ;;  %v1894_v3 = vld [vmem:[%s1882_s8 + $0x88] sm:$0xff]  ;;  %v1919_v12 = vld [vmem:[%s1882_s8 + $0x90] sm:$0xff]  ;;  %s1795_s5 = smov [#allocation2]  }
  0x1d   : > { %v1897_v4 = vld [vmem:[%s1882_s8 + $0x180] sm:$0xff]  ;;  %v1475_v5 = vpack.c.bf16 %v1894_v3, %v1891_v2  ;;  %v1902_v6 = vld [vmem:[%s1882_s8 + $0x188] sm:$0xff]  ;;  %v1926_v14 = vld [vmem:[%s1882_s8 + $0x98] sm:$0xff]  ;;  %p1731_p12 = pnand %p1730_p11, %p1856_p5  ;;  %s1733_s6 = sshll.u32 %s1795_s5, 4  ;;  %s1734_s6 = int_to_ptr.vmem [resolvable:$false] %s1733_s6 }
  0x1e   : > { %v1905_v7 = vld [vmem:[%s1882_s8] sm:$0xff]  ;;  %v1908_v8 = vld [vmem:[%s1882_s8 + $0x8] sm:$0xff]  ;;  %v1523_v9 = vpack.c.bf16 %v1902_v6, %v1897_v4  ;;  %v1929_v15 = vld [vmem:[%s1882_s8 + $0x190] sm:$0xff]  ;;  %v1481_v18 = vpack.c.bf16 %v1926_v14, %v1919_v12  ;;  %s1735_s7 = scalar_lea.vmem %s1734_s6, 128  ;;  %p1736_p0 = scmp.lt.s32.totalorder %s2433_s20, %s1734_s6 }
  0x1f   : > { %v1913_v10 = vld [vmem:[%s1882_s8 + $0x100] sm:$0xff]  ;;  %v1916_v11 = vld [vmem:[%s1882_s8 + $0x108] sm:$0xff]  ;;  %1477 = vmatprep.subr.msk.bf16.mxu0 %vm1886_vm1, %v1475_v5  ;;  %v1478_v13 = vpack.c.bf16 %v1908_v8, %v1905_v7  ;;  %v1932_v16 = vld [vmem:[%s1882_s8 + $0x198] sm:$0xff]  ;;  %p1732_p13 = pneg %p1731_p12  ;;  %p1737_p1 = scmp.lt.s32.totalorder %s1735_s7, %s1729_s30 }
  0x20   : > { %1525 = vmatprep.subr.msk.bf16.mxu1 %vm1886_vm1, %v1523_v9  ;;  %v1526_v17 = vpack.c.bf16 %v1916_v11, %v1913_v10  ;;  %v1529_v19 = vpack.c.bf16 %v1932_v16, %v1929_v15  ;;  %v1949_v20 = vld [vmem:[%s1882_s8 + $0x10] sm:$0xff]  ;;  %v1952_v21 = vld [vmem:[%s1882_s8 + $0x18] sm:$0xff]  ;;  %v1963_v24 = vld [vmem:[%s1882_s8 + $0xa0] sm:$0xff] }
  0x21   : > { %1480 = vmatpush3.bf16.xpose.msk.msra.mxu0 %vm1886_vm1, %v1478_v13  ;;  %v1955_v22 = vld [vmem:[%s1882_s8 + $0x110] sm:$0xff]  ;;  %v1960_v23 = vld [vmem:[%s1882_s8 + $0x118] sm:$0xff]  ;;  %v1966_v25 = vld [vmem:[%s1882_s8 + $0xa8] sm:$0xff]  ;;  %v1484_v29 = vpack.c.bf16 %v1952_v21, %v1949_v20  ;;  %p1738_p2 = por %p1737_p1, %p1736_p0 }
  0x22   : > { %1528 = vmatpush3.bf16.xpose.msk.msra.mxu1 %vm1886_vm1, %v1526_v17  ;;  %1483 = vmatprep.subr.msk.bf16.mxu0 %vm1886_vm1, %v1481_v18  ;;  %v1969_v26 = vld [vmem:[%s1882_s8 + $0x1a0] sm:$0xff]  ;;  %v1972_v27 = vld [vmem:[%s1882_s8 + $0x1a8] sm:$0xff]  ;;  %v1532_v30 = vpack.c.bf16 %v1960_v23, %v1955_v22  ;;  %v1487_v31 = vpack.c.bf16 %v1966_v25, %v1963_v24  ;;  %v2003_v37 = vld [vmem:[%s1882_s8 + $0xb0] sm:$0xff] }
  0x23   : > { %1531 = vmatprep.subr.msk.bf16.mxu1 %vm1886_vm1, %v1529_v19  ;;  %v1535_v32 = vpack.c.bf16 %v1972_v27, %v1969_v26  ;;  %v1989_v33 = vld [vmem:[%s1882_s8 + $0x20] sm:$0xff]  ;;  %v1992_v34 = vld [vmem:[%s1882_s8 + $0x28] sm:$0xff]  ;;  %v2006_v38 = vld [vmem:[%s1882_s8 + $0xb8] sm:$0xff]  ;;  %p1739_p3 = pnand %p1738_p2, %p1732_p13 }
  0x24   : > { %v1995_v35 = vld [vmem:[%s1882_s8 + $0x120] sm:$0xff]  ;;  %v2000_v36 = vld [vmem:[%s1882_s8 + $0x128] sm:$0xff]  ;;  %v2009_v39 = vld [vmem:[%s1882_s8 + $0x1b0] sm:$0xff]  ;;  %v1490_v41 = vpack.c.bf16 %v1992_v34, %v1989_v33  ;;  %v1493_v43 = vpack.c.bf16 %v2006_v38, %v2003_v37 }
  0x25   : > { %v2012_v40 = vld [vmem:[%s1882_s8 + $0x1b8] sm:$0xff]  ;;  %v1538_v42 = vpack.c.bf16 %v2000_v36, %v1995_v35  ;;  %v2032_v46 = vld [vmem:[%s1882_s8 + $0x30] sm:$0xff]  ;;  %v2046_v50 = vld [vmem:[%s1882_s8 + $0xc0] sm:$0xff] }
  0x26   : > { %v1541_v44 = vpack.c.bf16 %v2012_v40, %v2009_v39  ;;  %v2035_v47 = vld [vmem:[%s1882_s8 + $0x38] sm:$0xff]  ;;  %v2038_v48 = vld [vmem:[%s1882_s8 + $0x130] sm:$0xff]  ;;  %v2049_v51 = vld [vmem:[%s1882_s8 + $0xc8] sm:$0xff] }
  0x27   : > { %v2043_v49 = vld [vmem:[%s1882_s8 + $0x138] sm:$0xff]  ;;  %v2052_v52 = vld [vmem:[%s1882_s8 + $0x1c0] sm:$0xff]  ;;  %v2055_v53 = vld [vmem:[%s1882_s8 + $0x1c8] sm:$0xff]  ;;  %v1496_v54 = vpack.c.bf16 %v2035_v47, %v2032_v46  ;;  %v1499_v56 = vpack.c.bf16 %v2049_v51, %v2046_v50 }
  0x28   : > { %v1544_v55 = vpack.c.bf16 %v2043_v49, %v2038_v48  ;;  %v1547_v57 = vpack.c.bf16 %v2055_v53, %v2052_v52  ;;  %v2072_v58 = vld [vmem:[%s1882_s8 + $0x40] sm:$0xff]  ;;  %v2075_v59 = vld [vmem:[%s1882_s8 + $0x48] sm:$0xff]  ;;  %v2086_v62 = vld [vmem:[%s1882_s8 + $0xd0] sm:$0xff] }
  0x29   : > { %1486 = vmatpush3.bf16.xpose.msk.msra.mxu0 %vm1886_vm1, %v1484_v29  ;;  %v2078_v60 = vld [vmem:[%s1882_s8 + $0x140] sm:$0xff]  ;;  %v2083_v61 = vld [vmem:[%s1882_s8 + $0x148] sm:$0xff]  ;;  %v2089_v63 = vld [vmem:[%s1882_s8 + $0xd8] sm:$0xff]  ;;  %v1502_v13 = vpack.c.bf16 %v2075_v59, %v2072_v58 }
  0x2a   : > { %1534 = vmatpush3.bf16.xpose.msk.msra.mxu1 %vm1886_vm1, %v1532_v30  ;;  %1489 = vmatprep.subr.msk.bf16.mxu0 %vm1886_vm1, %v1487_v31  ;;  %v2092_v5 = vld [vmem:[%s1882_s8 + $0x1d0] sm:$0xff]  ;;  %v2095_v9 = vld [vmem:[%s1882_s8 + $0x1d8] sm:$0xff]  ;;  %v1550_v17 = vpack.c.bf16 %v2083_v61, %v2078_v60  ;;  %v1505_v18 = vpack.c.bf16 %v2089_v63, %v2086_v62 }
  0x2b   : > { %1537 = vmatprep.subr.msk.bf16.mxu1 %vm1886_vm1, %v1535_v32  ;;  %v1553_v19 = vpack.c.bf16 %v2095_v9, %v2092_v5  ;;  %v2112_v28 = vld [vmem:[%s1882_s8 + $0x50] sm:$0xff]  ;;  %v2115_v29 = vld [vmem:[%s1882_s8 + $0x58] sm:$0xff]  ;;  %v2126_v32 = vld [vmem:[%s1882_s8 + $0xe0] sm:$0xff] }
  0x2c   : > { %v2118_v30 = vld [vmem:[%s1882_s8 + $0x150] sm:$0xff]  ;;  %v2123_v31 = vld [vmem:[%s1882_s8 + $0x158] sm:$0xff]  ;;  %2492 = vst [vmem:[#allocation5_spill] sm:$0xff] %v2126_v32 }
  0x2d   : > { %v1556_v45 = vpack.c.bf16 %v2123_v31, %v2118_v30 }
  0x31   : > { %1492 = vmatpush3.bf16.xpose.msk.msra.mxu0 %vm1886_vm1, %v1490_v41  ;;  %v2129_v41 = vld [vmem:[%s1882_s8 + $0xe8] sm:$0xff] }
  0x32   : > { %1540 = vmatpush3.bf16.xpose.msk.msra.mxu1 %vm1886_vm1, %v1538_v42  ;;  %1495 = vmatprep.subr.msk.bf16.mxu0 %vm1886_vm1, %v1493_v43  ;;  %2493 = vst [vmem:[#allocation6_spill] sm:$0xff] %v2129_v41  ;;  %v2132_v42 = vld [vmem:[%s1882_s8 + $0x1e0] sm:$0xff]  ;;  %v2135_v43 = vld [vmem:[%s1882_s8 + $0x1e8] sm:$0xff] }
  0x33   : > { %1543 = vmatprep.subr.msk.bf16.mxu1 %vm1886_vm1, %v1541_v44  ;;  %2494 = vst [vmem:[#allocation7_spill] sm:$0xff] %v2132_v42  ;;  %2495 = vst [vmem:[#allocation8_spill] sm:$0xff] %v2135_v43  ;;  %v1508_v44 = vpack.c.bf16 %v2115_v29, %v2112_v28 }
  0x39   : > { %1498 = vmatpush3.bf16.xpose.msk.msra.mxu0 %vm1886_vm1, %v1496_v54  ;;  %v1511_v54 = vpack.c.bf16 %v2129_v41, %v2126_v32  ;;  %v280_v41 = vmul.f32 %v1891_v2, %v1891_v2  ;;  %v281_v32 = vmul.f32 %v1894_v3, %v1894_v3  ;;  %v2208_v2 = vld [vmem:[%s1882_s8 + $0x170] sm:$0xff]  ;;  %v2211_v3 = vld [vmem:[%s1882_s8 + $0x178] sm:$0xff] }
  0x3a   : > { %1546 = vmatpush3.bf16.xpose.msk.msra.mxu1 %vm1886_vm1, %v1544_v55  ;;  %1501 = vmatprep.subr.msk.bf16.mxu0 %vm1886_vm1, %v1499_v56  ;;  %v1559_v55 = vpack.c.bf16 %v2135_v43, %v2132_v42  ;;  %v2152_v56 = vld [vmem:[%s1882_s8 + $0x60] sm:$0xff] }
  0x3b   : > { %1549 = vmatprep.subr.msk.bf16.mxu1 %vm1886_vm1, %v1547_v57  ;;  %v2155_v57 = vld [vmem:[%s1882_s8 + $0x68] sm:$0xff] }
  0x41   : > { %1504 = vmatpush3.bf16.xpose.msk.msra.mxu0 %vm1886_vm1, %v1502_v13  ;;  %v2158_v13 = vld [vmem:[%s1882_s8 + $0x160] sm:$0xff] }
  0x42   : > { %1552 = vmatpush3.bf16.xpose.msk.msra.mxu1 %vm1886_vm1, %v1550_v17  ;;  %1507 = vmatprep.subr.msk.bf16.mxu0 %vm1886_vm1, %v1505_v18  ;;  %v2163_v17 = vld [vmem:[%s1882_s8 + $0x168] sm:$0xff]  ;;  %v2166_v18 = vld [vmem:[%s1882_s8 + $0xf0] sm:$0xff] }
  0x43   : > { %1555 = vmatprep.subr.msk.bf16.mxu1 %vm1886_vm1, %v1553_v19  ;;  %2496 = vst [vmem:[#allocation9_spill] sm:$0xff] %v2163_v17  ;;  %2497 = vst [vmem:[#allocation10_spill] sm:$0xff] %v2166_v18  ;;  %v2169_v19 = vld [vmem:[%s1882_s8 + $0xf8] sm:$0xff]  ;;  %v1562_v43 = vpack.c.bf16 %v2163_v17, %v2158_v13  ;;  %v2196_v17 = vld [vmem:[%s1882_s8 + $0x70] sm:$0xff] }
  0x44   : > { %2498 = vst [vmem:[#allocation11_spill] sm:$0xff] %v2169_v19 }
  0x49   : > { %1510 = vmatpush3.bf16.xpose.msk.msra.mxu0 %vm1886_vm1, %v1508_v44  ;;  %v2172_v44 = vld [vmem:[%s1882_s8 + $0x1f0] sm:$0xff] }
  0x4a   : > { %1558 = vmatpush3.bf16.xpose.msk.msra.mxu1 %vm1886_vm1, %v1556_v45  ;;  %1513 = vmatprep.subr.msk.bf16.mxu0 %vm1886_vm1, %v1511_v54  ;;  %2499 = vst [vmem:[#allocation12_spill] sm:$0xff] %v2172_v44  ;;  %v2175_v45 = vld [vmem:[%s1882_s8 + $0x1f8] sm:$0xff]  ;;  %v1514_v54 = vpack.c.bf16 %v2155_v57, %v2152_v56 }
  0x4b   : > { %1561 = vmatprep.subr.msk.bf16.mxu1 %vm1886_vm1, %v1559_v55  ;;  %2500 = vst [vmem:[#allocation13_spill] sm:$0xff] %v2175_v45  ;;  %v1517_v55 = vpack.c.bf16 %v2169_v19, %v2166_v18  ;;  %v1565_v42 = vpack.c.bf16 %v2175_v45, %v2172_v44  ;;  %v2199_v19 = vld [vmem:[%s1882_s8 + $0x78] sm:$0xff]  ;;  %v312_v45 = vmul.f32 %v1897_v4, %v1897_v4 }
  0x4c   : > { %2501 = vst [vmem:[#allocation14_spill] sm:$0xff] %v2199_v19  ;;  %v1568_v44 = vpack.c.bf16 %v2211_v3, %v2208_v2  ;;  %v264_v4 = vmul.f32 %v1905_v7, %v1905_v7  ;;  %v282_v7 = vmul.f32 %v1919_v12, %v1919_v12  ;;  %v2246_v12 = vld [vmem:[%s2474_s1] sm:$0xff] }
  0x51   : > { %1516 = vmatpush3.bf16.xpose.msk.msra.mxu0 %vm1886_vm1, %v1514_v54  ;;  %v313_v54 = vmul.f32 %v1902_v6, %v1902_v6  ;;  %v265_v6 = vmul.f32 %v1908_v8, %v1908_v8  ;;  %v283_v8 = vmul.f32 %v1926_v14, %v1926_v14  ;;  %v266_v14 = vmul.f32 %v1949_v20, %v1949_v20 }
  0x52   : > { %1564 = vmatpush3.bf16.xpose.msk.msra.mxu1 %vm1886_vm1, %v1562_v43  ;;  %1519 = vmatprep.subr.msk.bf16.mxu0 %vm1886_vm1, %v1517_v55  ;;  %v1520_v43 = vpack.c.bf16 %v2199_v19, %v2196_v17  ;;  %v1571_v55 = vpack.c.bf16 %v281_v32, %v280_v41  ;;  %v297_v19 = vmul.f32 %v1916_v11, %v1916_v11 }
  0x53   : > { %1567 = vmatprep.subr.msk.bf16.mxu1 %vm1886_vm1, %v1565_v42  ;;  %v1619_v18 = vpack.c.bf16 %v313_v54, %v312_v45  ;;  %v296_v42 = vmul.f32 %v1913_v10, %v1913_v10  ;;  %v314_v10 = vmul.f32 %v1929_v15, %v1929_v15  ;;  %v315_v11 = vmul.f32 %v1932_v16, %v1932_v16 }
  0x54   : > { %v1574_v32 = vpack.c.bf16 %v265_v6, %v264_v4  ;;  %v267_v15 = vmul.f32 %v1952_v21, %v1952_v21  ;;  %v298_v16 = vmul.f32 %v1955_v22, %v1955_v22  ;;  %v284_v20 = vmul.f32 %v1963_v24, %v1963_v24 }
  0x55   : > { %v1622_v41 = vpack.c.bf16 %v297_v19, %v296_v42  ;;  %v1625_v45 = vpack.c.bf16 %v315_v11, %v314_v10  ;;  %v285_v21 = vmul.f32 %v1966_v25, %v1966_v25  ;;  %v317_v22 = vmul.f32 %v1972_v27, %v1972_v27 }
  0x56   : > { %v268_v25 = vmul.f32 %v1989_v33, %v1989_v33  ;;  %v301_v27 = vmul.f32 %v2000_v36, %v2000_v36  ;;  %v286_v33 = vmul.f32 %v2003_v37, %v2003_v37  ;;  %v319_v36 = vmul.f32 %v2012_v40, %v2012_v40 }
  0x57   : > { %v1583_v19 = vpack.c.bf16 %v285_v21, %v284_v20  ;;  %v271_v37 = vmul.f32 %v2035_v47, %v2035_v47  ;;  %v288_v40 = vmul.f32 %v2046_v50, %v2046_v50  ;;  %v320_v47 = vmul.f32 %v2052_v52, %v2052_v52 }
  0x58   : > { %v273_v50 = vmul.f32 %v2075_v59, %v2075_v59  ;;  %v305_v52 = vmul.f32 %v2083_v61, %v2083_v61  ;;  %v322_v59 = vmul.f32 %v2092_v5, %v2092_v5  ;;  %v307_v5 = vmul.f32 %v2123_v31, %v2123_v31 }
  0x59   : > { %1522 = vmatpush3.bf16.xpose.msk.msra.mxu0 %vm1886_vm1, %v1520_v43  ;;  %v269_v43 = vmul.f32 %v1992_v34, %v1992_v34  ;;  %v287_v34 = vmul.f32 %v2006_v38, %v2006_v38  ;;  %v302_v38 = vmul.f32 %v2038_v48, %v2038_v48  ;;  %v321_v48 = vmul.f32 %v2055_v53, %v2055_v53 }
  0x5a   : > { %1570 = vmatpush3.bf16.xpose.msk.msra.mxu1 %vm1886_vm1, %v1568_v44  ;;  %1573 = vmatprep.subr.msk.bf16.mxu0 %vm1886_vm1, %v1571_v55  ;;  %v1577_v44 = vpack.c.bf16 %v283_v8, %v282_v7  ;;  %v270_v7 = vmul.f32 %v2032_v46, %v2032_v46  ;;  %v289_v46 = vmul.f32 %v2049_v51, %v2049_v51 }
  0x5b   : > { %1621 = vmatprep.subr.msk.bf16.mxu1 %vm1886_vm1, %v1619_v18  ;;  %v299_v18 = vmul.f32 %v1960_v23, %v1960_v23  ;;  %v1580_v23 = vpack.c.bf16 %v267_v15, %v266_v14  ;;  %v1586_v55 = vpack.c.bf16 %v269_v43, %v268_v25  ;;  %v1589_v6 = vpack.c.bf16 %v287_v34, %v286_v33  ;;  %v2503_v15 = vld [vmem:[#allocation6_spill] sm:$0xff]  ;;  %v2510_v33 = vld [vmem:[#allocation13_spill] sm:$0xff] }
  0x5c   : > { %v1595_v10 = vpack.c.bf16 %v289_v46, %v288_v40  ;;  %v1643_v11 = vpack.c.bf16 %v321_v48, %v320_v47  ;;  %v304_v51 = vmul.f32 %v2078_v60, %v2078_v60  ;;  %v290_v53 = vmul.f32 %v2086_v62, %v2086_v62  ;;  %v2507_v43 = vld [vmem:[#allocation10_spill] sm:$0xff] }
  0x5d   : > { %v1628_v24 = vpack.c.bf16 %v299_v18, %v298_v16  ;;  %v323_v60 = vmul.f32 %v2095_v9, %v2095_v9  ;;  %v274_v14 = vmul.f32 %v2112_v28, %v2112_v28  ;;  %v275_v62 = vmul.f32 %v2115_v29, %v2115_v29  ;;  %v2502_v9 = vld [vmem:[#allocation5_spill] sm:$0xff]  ;;  %v2505_v18 = vld [vmem:[#allocation8_spill] sm:$0xff] }
  0x5e   : > { %v292_v28 = vmul.f32 %v2502_v9, %v2502_v9  ;;  %v293_v29 = vmul.f32 %v2503_v15, %v2503_v15  ;;  %v325_v31 = vmul.f32 %v2505_v18, %v2505_v18  ;;  %v327_v34 = vmul.f32 %v2510_v33, %v2510_v33 }
  0x5f   : > { %v1604_v20 = vpack.c.bf16 %v275_v62, %v274_v14 }
  0x60   : > { %1372 = vmatmul.mubr.msk.f32.vlgmr.msra.gmra.mrb[0].mxu0 %vm329_vm0, %v1871_v0 }
  0x61   : > { %1406 = vmatmul.mubr.msk.f32.vlgmr.msra.gmra.mrb[0].mxu1 %vm329_vm0, %v1871_v0  ;;  %1576 = vmatpush3.bf16.xpose.msk.msra.mxu0 %vm1886_vm1, %v1574_v32  ;;  %v316_v0 = vmul.f32 %v1969_v26, %v1969_v26  ;;  %v300_v26 = vmul.f32 %v1995_v35, %v1995_v35  ;;  %v318_v35 = vmul.f32 %v2009_v39, %v2009_v39 }
  0x62   : > { %1624 = vmatpush3.bf16.xpose.msk.msra.mxu1 %vm1886_vm1, %v1622_v41  ;;  %1579 = vmatprep.subr.msk.bf16.mxu0 %vm1886_vm1, %v1577_v44  ;;  %v303_v39 = vmul.f32 %v2043_v49, %v2043_v49  ;;  %v1592_v49 = vpack.c.bf16 %v271_v37, %v270_v7  ;;  %v272_v32 = vmul.f32 %v2072_v58, %v2072_v58 }
  0x63   : > { %1627 = vmatprep.subr.msk.bf16.mxu1 %vm1886_vm1, %v1625_v45  ;;  %1439 = vmatprep.mubr.msk.f32.mxu0 %vm329_vm0, %v2246_v12  ;;  %v1631_v54 = vpack.c.bf16 %v317_v22, %v316_v0  ;;  %v1634_v4 = vpack.c.bf16 %v301_v27, %v300_v26  ;;  %v1637_v42 = vpack.c.bf16 %v319_v36, %v318_v35  ;;  %v2508_v26 = vld [vmem:[#allocation11_spill] sm:$0xff] }
  0x64   : > { %1473 = vmatprep.mubr.msk.f32.mxu1 %vm329_vm0, %v2246_v12  ;;  %v1640_v8 = vpack.c.bf16 %v303_v39, %v302_v38  ;;  %v291_v58 = vmul.f32 %v2089_v63, %v2089_v63  ;;  %v1598_v61 = vpack.c.bf16 %v273_v50, %v272_v32  ;;  %v1646_v41 = vpack.c.bf16 %v305_v52, %v304_v51 }
  0x65   : > { %v1649_v45 = vpack.c.bf16 %v323_v60, %v322_v59  ;;  %v306_v63 = vmul.f32 %v2118_v30, %v2118_v30  ;;  %v2504_v30 = vld [vmem:[#allocation7_spill] sm:$0xff]  ;;  %v1607_v0 = vpack.c.bf16 %v293_v29, %v292_v28  ;;  %v310_v37 = vmul.f32 %v2208_v2, %v2208_v2 }
  0x66   : > { %v1601_v44 = vpack.c.bf16 %v291_v58, %v290_v53  ;;  %v324_v16 = vmul.f32 %v2504_v30, %v2504_v30  ;;  %v311_v38 = vmul.f32 %v2211_v3, %v2211_v3 }
  0x67   : > { %v1652_v21 = vpack.c.bf16 %v307_v5, %v306_v63 }
  0x68   : > { %v1655_v22 = vpack.c.bf16 %v325_v31, %v324_v16  ;;  %v1664_v39 = vpack.c.bf16 %v311_v38, %v310_v37 }
  0x69   : > { %1582 = vmatpush3.bf16.xpose.msk.msra.mxu0 %vm1886_vm1, %v1580_v23  ;;  %v276_v23 = vmul.f32 %v2152_v56, %v2152_v56  ;;  %v294_v56 = vmul.f32 %v2507_v43, %v2507_v43 }
  0x6a   : > { %1630 = vmatpush3.bf16.xpose.msk.msra.mxu1 %vm1886_vm1, %v1628_v24  ;;  %1585 = vmatprep.subr.msk.bf16.mxu0 %vm1886_vm1, %v1583_v19  ;;  %v277_v24 = vmul.f32 %v2155_v57, %v2155_v57  ;;  %v308_v19 = vmul.f32 %v2158_v13, %v2158_v13  ;;  %v295_v57 = vmul.f32 %v2508_v26, %v2508_v26  ;;  %v2509_v13 = vld [vmem:[#allocation12_spill] sm:$0xff] }
  0x6b   : > { %1633 = vmatprep.subr.msk.bf16.mxu1 %vm1886_vm1, %v1631_v54  ;;  %v2506_v54 = vld [vmem:[#allocation9_spill] sm:$0xff]  ;;  %v326_v27 = vmul.f32 %v2509_v13, %v2509_v13 }
  0x6c   : > { %v309_v25 = vmul.f32 %v2506_v54, %v2506_v54  ;;  %v1610_v35 = vpack.c.bf16 %v277_v24, %v276_v23 }
  0x6e   : > { %v1658_v36 = vpack.c.bf16 %v309_v25, %v308_v19 }
  0x71   : > { %1588 = vmatpush3.bf16.xpose.msk.msra.mxu0 %vm1886_vm1, %v1586_v55  ;;  %v1613_v55 = vpack.c.bf16 %v295_v57, %v294_v56 }
  0x72   : > { %1636 = vmatpush3.bf16.xpose.msk.msra.mxu1 %vm1886_vm1, %v1634_v4  ;;  %1591 = vmatprep.subr.msk.bf16.mxu0 %vm1886_vm1, %v1589_v6  ;;  %v1661_v4 = vpack.c.bf16 %v327_v34, %v326_v27  ;;  %v278_v6 = vmul.f32 %v2196_v17, %v2196_v17 }
  0x73   : > { %1639 = vmatprep.subr.msk.bf16.mxu1 %vm1886_vm1, %v1637_v42  ;;  %v2511_v42 = vld [vmem:[#allocation14_spill] sm:$0xff] }
  0x74   : > { %v279_v7 = vmul.f32 %v2511_v42, %v2511_v42 }
  0x76   : > { %v1616_v17 = vpack.c.bf16 %v279_v7, %v278_v6 }
  0x79   : > { %1594 = vmatpush3.bf16.xpose.msk.msra.mxu0 %vm1886_vm1, %v1592_v49 }
  0x7a   : > { %1642 = vmatpush3.bf16.xpose.msk.msra.mxu1 %vm1886_vm1, %v1640_v8  ;;  %1597 = vmatprep.subr.msk.bf16.mxu0 %vm1886_vm1, %v1595_v10 }
  0x7b   : > { %1645 = vmatprep.subr.msk.bf16.mxu1 %vm1886_vm1, %v1643_v11 }
  0x81   : > { %1600 = vmatpush3.bf16.xpose.msk.msra.mxu0 %vm1886_vm1, %v1598_v61 }
  0x82   : > { %1648 = vmatpush3.bf16.xpose.msk.msra.mxu1 %vm1886_vm1, %v1646_v41  ;;  %1603 = vmatprep.subr.msk.bf16.mxu0 %vm1886_vm1, %v1601_v44 }
  0x83   : > { %1651 = vmatprep.subr.msk.bf16.mxu1 %vm1886_vm1, %v1649_v45 }
  0x89   : > { %1606 = vmatpush3.bf16.xpose.msk.msra.mxu0 %vm1886_vm1, %v1604_v20 }
  0x8a   : > { %1654 = vmatpush3.bf16.xpose.msk.msra.mxu1 %vm1886_vm1, %v1652_v21  ;;  %1609 = vmatprep.subr.msk.bf16.mxu0 %vm1886_vm1, %v1607_v0 }
  0x8b   : > { %1657 = vmatprep.subr.msk.bf16.mxu1 %vm1886_vm1, %v1655_v22 }
  0x91   : > { %1612 = vmatpush3.bf16.xpose.msk.msra.mxu0 %vm1886_vm1, %v1610_v35 }
  0x92   : > { %1660 = vmatpush3.bf16.xpose.msk.msra.mxu1 %vm1886_vm1, %v1658_v36  ;;  %1615 = vmatprep.subr.msk.bf16.mxu0 %vm1886_vm1, %v1613_v55 }
  0x93   : > { %1663 = vmatprep.subr.msk.bf16.mxu1 %vm1886_vm1, %v1661_v4 }
  0x97   : > { %v1008_v2 = vpop.permute.xlu0 %1007 }
  0x99   : > { %1618 = vmatpush3.bf16.xpose.msk.msra.mxu0 %vm1886_vm1, %v1616_v17 }
  0x9a   : > { %1666 = vmatpush3.bf16.xpose.msk.msra.mxu1 %vm1886_vm1, %v1664_v39 }
  0xa0   : > { %1440 = vmatmul.mubr.msk.f32.vlgmr.msra.gmra.mrb[0].mxu0 %vm329_vm0, %v2246_v12 }
  0xa1   : > { %1474 = vmatmul.mubr.msk.f32.vlgmr.msra.gmra.mrb[0].mxu1 %vm329_vm0, %v2246_v12 }
 0x173   : > { %v928_v3 = vpop.f32.mrb[0].mxu0 }
 0x174   : > { %v1010_v40 = vadd.f32 %v1008_v2, %v928_v3  ;;  %v999_v46 = vpop.f32.mrb[0].mxu1  ;;  %v930_v47 = vpop.f32.mrb[1].mxu0 }
 0x175   : > { %v1012_v48 = vadd.f32 %v1008_v2, %v999_v46  ;;  %v1011_v49 = vadd.f32 %v1008_v2, %v930_v47  ;;  %v1001_v8 = vpop.f32.mrb[1].mxu1 }
 0x176   : > { %v1014_v10 = vrot.slane %v1010_v40, 4  ;;  %v1013_v11 = vadd.f32 %v1008_v2, %v1001_v8  ;;  %v1095_v8 = vlaneseq }
 0x177   : > { %v1026_v32 = vrot.slane %v1012_v48, 4  ;;  %v1020_v50 = vrot.slane %v1011_v49, 4 }
 0x178   : > { %v1015_v1 = vmax.f32 %v1010_v40, %v1014_v10  ;;  %v1032_v51 = vrot.slane %v1013_v11, 4  ;;  %vm1117_vm2 = vcmp.lt.s32.totalorder %v1095_v8, 512 }
 0x179   : > { %v1027_v52 = vmax.f32 %v1012_v48, %v1026_v32  ;;  %v1021_v53 = vmax.f32 %v1011_v49, %v1020_v50 }
 0x17a   : > { %v1016_v58 = vrot.slane %v1015_v1, 2  ;;  %v1033_v59 = vmax.f32 %v1013_v11, %v1032_v51 }
 0x17b   : > { %v1028_v60 = vrot.slane %v1027_v52, 2  ;;  %v1022_v12 = vrot.slane %v1021_v53, 2 }
 0x17c   : > { %v1017_v61 = vmax.f32 %v1015_v1, %v1016_v58  ;;  %v1034_v41 = vrot.slane %v1033_v59, 2  ;;  %v1096_v1 = vshrl.u32 %v1095_v8, 7 }
 0x17d   : > { %v1029_v44 = vmax.f32 %v1027_v52, %v1028_v60  ;;  %v1023_v45 = vmax.f32 %v1021_v53, %v1022_v12 }
 0x17e   : > { %v1018_v14 = vrot.slane %v1017_v61, 1  ;;  %v1035_v62 = vmax.f32 %v1033_v59, %v1034_v41 }
 0x17f   : > { %v1030_v63 = vrot.slane %v1029_v44, 1  ;;  %v1024_v5 = vrot.slane %v1023_v45, 1 }
 0x180   : > { %v1019_v9 = vmax.f32 %v1017_v61, %v1018_v14  ;;  %v1036_v28 = vrot.slane %v1035_v62, 1 }
 0x181   : > { %v1031_v15 = vmax.f32 %v1029_v44, %v1030_v63  ;;  %v1025_v29 = vmax.f32 %v1023_v45, %v1024_v5 }
 0x182   : > { %v1038_v30 = vsub.f32 %v1010_v40, %v1019_v9  ;;  %v2422_v16 = vmax.f32 %v1035_v62, %v1036_v28 }
 0x183   : > { %v1040_v18 = vsub.f32 %v1012_v48, %v1031_v15  ;;  %v1039_v31 = vsub.f32 %v1011_v49, %v1025_v29  ;;  %v1794_v48 = vmov 1966171168  }
 0x184   : > { %v1042_v20 = vmul.f32 1.442695, %v1038_v30  ;;  %v1041_v21 = vsub.f32 %v1013_v11, %v2422_v16  ;;  %v1093_v49 = vunpack.c.l.s4 %v1794_v48 }
 0x185   : > { %v1046_v0 = vmul.f32 1.442695, %v1040_v18  ;;  %v1044_v22 = vmul.f32 1.442695, %v1039_v31 }
 0x186   : > { %1713 = vpow2.f32 %v1042_v20  ;;  %v1048_v23 = vmul.f32 1.442695, %v1041_v21  ;;  %v1094_v50 = vunpack.c.0.s8 %v1093_v49 }
 0x187   : > { %1715 = vpow2.f32 %v1046_v0 }
 0x188   : > { %1717 = vpow2.f32 %v1044_v22  ;;  %v1097_v41 = vsub.s32 %v1094_v50, %v1096_v1 }
 0x189   : > { %1719 = vpow2.f32 %v1048_v23 }
 0x190   : > { %v1714_v24 = vpop.eup %1713 }
 0x191   : > { %v1716_v19 = vpop.eup %1715  ;;  %v1050_v54 = vrot.slane %v1714_v24, 4 }
 0x192   : > { %v1718_v25 = vpop.eup %1717  ;;  %v1062_v43 = vrot.slane %v1716_v19, 4 }
 0x193   : > { %v1720_v56 = vpop.eup %1719  ;;  %v1051_v26 = vadd.f32 %v1714_v24, %v1050_v54  ;;  %v1056_v57 = vrot.slane %v1718_v25, 4 }
 0x194   : > { %v1063_v13 = vadd.f32 %v1716_v19, %v1062_v43  ;;  %v1068_v27 = vrot.slane %v1720_v56, 4 }
 0x195   : > { %v1052_v33 = vrot.slane %v1051_v26, 2  ;;  %v1057_v34 = vadd.f32 %v1718_v25, %v1056_v57 }
 0x196   : > { %v1064_v35 = vrot.slane %v1063_v13, 2  ;;  %v1069_v36 = vadd.f32 %v1720_v56, %v1068_v27 }
 0x197   : > { %v1053_v55 = vadd.f32 %v1052_v33, %v1051_v26  ;;  %v1058_v4 = vrot.slane %v1057_v34, 2 }
 0x198   : > { %v1065_v6 = vadd.f32 %v1064_v35, %v1063_v13  ;;  %v1070_v42 = vrot.slane %v1069_v36, 2 }
 0x199   : > { %v1054_v7 = vrot.slane %v1053_v55, 1  ;;  %v1059_v37 = vadd.f32 %v1058_v4, %v1057_v34 }
 0x19a   : > { %v1066_v38 = vrot.slane %v1065_v6, 1  ;;  %v1071_v17 = vadd.f32 %v1070_v42, %v1069_v36 }
 0x19b   : > { %v1055_v39 = vadd.f32 %v1054_v7, %v1053_v55  ;;  %v1060_v2 = vrot.slane %v1059_v37, 1 }
 0x19c   : > { %v1067_v3 = vadd.f32 %v1066_v38, %v1065_v6  ;;  %v1072_v40 = vrot.slane %v1071_v17, 1 }
 0x19d   : > { %1721 = vlog2.f32 %v1055_v39  ;;  %v1061_v46 = vadd.f32 %v1060_v2, %v1059_v37 }
 0x19e   : > { %1723 = vlog2.f32 %v1067_v3  ;;  %v1073_v47 = vadd.f32 %v1072_v40, %v1071_v17 }
 0x19f   : > { %1725 = vlog2.f32 %v1061_v46 }
 0x1a0   : > { %1727 = vlog2.f32 %v1073_v47 }
 0x1a7   : > { %v1722_v10 = vpop.eup %1721 }
 0x1a8   : > { %v1724_v11 = vpop.eup %1723  ;;  %v1075_v32 = vmul.f32 0.6931472, %v1722_v10 }
 0x1a9   : > { %v1726_v51 = vpop.eup %1725  ;;  %v1079_v52 = vmul.f32 0.6931472, %v1724_v11 }
 0x1aa   : > { %v1728_v53 = vpop.eup %1727  ;;  %v1082_v58 = vadd.f32 %v1075_v32, %v1019_v9  ;;  %v1077_v59 = vmul.f32 0.6931472, %v1726_v51 }
 0x1ab   : > { %v1084_v60 = vadd.f32 %v1079_v52, %v1031_v15  ;;  %v1081_v12 = vmul.f32 0.6931472, %v1728_v53 }
 0x1ac   : > { %v1083_v61 = vadd.f32 %v1077_v59, %v1025_v29 }
 0x1ad   : > { %v1085_v44 = vadd.f32 %v1081_v12, %v2422_v16 }
 0x1ae   : > { %v1090_v45 = vcombine.low %v1082_v58, %v1083_v61 }
 0x1af   : > { %v1091_v14 = vcombine.low %v1084_v60, %v1085_v44 }
 0x1b0   : > { %v1098_v62 = vrot.slane %v1090_v45, %v1097_v41 }
 0x1b1   : > { %v1105_v63 = vrot.slane %v1091_v14, %v1097_v41 }
 0x1b3   : > { %v1106_v5 = vcombine.low %v1098_v62, %v1105_v63 }
 0x1b5   : > { %v1113_v28 = vrot.slane %v1106_v5, %v1097_v41 }
 0x1b7   : > { %1119 = vst.msk [vmem:[%s191_s19] sm:$0xf] %vm1117_vm2, %v1113_v28 }
 0x1b8   : > { %1742 = shalt.err (!%p1739_p3)
}
 0x1b9   : > { %s1743_s27 = scalar_lea.hbm %s2431_s28, 64  ;;  %s1747_s10 = scalar_lea.hbm %s2477_s4, 128 }
 0x1ba   : > { %p1744_p4 = scmp.ne.s32.totalorder %s2431_s28, %s1743_s27  ;;  %p1748_p9 = scmp.lt.u32.totalorder %s2431_s28, %s2477_s4 }
 0x1bb   : > { %p1749_p10 = scmp.lt.u32.totalorder %s1747_s10, %s1743_s27  ;;  %p1751_p12 = scmp.lt.u32.totalorder %s1743_s27, %s2431_s28 }
 0x1bc   : > { %p1745_p7 = pnand %p1744_p4, %p1856_p5 }
 0x1bd   : > { %p1750_p11 = por %p1749_p10, %p1748_p9 }
 0x1be   : > { %p1746_p8 = pneg %p1745_p7 }
 0x1bf   : > { %p1752_p13 = por %p1751_p12, %p1750_p11 }
 0x1c1   : > { %p1753_p0 = pnand %p1752_p13, %p1746_p8 }
 0x1c3   : > { %1756 = shalt.err (!%p1753_p0)
}
 0x1c4   : > { %1671 = dma.vmem_to_hbm [thread:$0]  (%p1856_p5), %s2433_s20, 64, %s2431_s28, %s1121_s29  }
 0x1c5 PF: > { %p1677_p1 = scmp.ge.s32.totalorder %s1791_s18, 2  ;;  %s1147_s13 = sand.u32 1, %s1779_s15  }
 0x1c6   : > { %s1148_s14 = scalar_lea.sflag [#allocation3], %s1147_s13 }
 0x1c7   : > { %p1674_p2 = pnand %p1677_p1, %p1860_p6 }
 0x1c9   : > { %1774 = dma.done.wait (!%p1674_p2), %s1148_s14, 64  }
 0x1ca   : > { %1776 = vsyncadd (!%p1674_p2), %s1148_s14, 4294967232  ;;  %p14_p3 = scmp.ge.s32.totalorder %s1844_s21, 4   ;;  %s2512_s15 = smov %s1783_s16 }
 0x1cb   : > { %s2513_s16 = smov %s1787_s17  ;;  %s2514_s17 = smov %s1854_s24 }
 0x1cc   : > { %s2515_s18 = smov %s1844_s21  ;;  %16 = sbr.rel (!%p14_p3) target bundleno = 3 (0x3), region = 71 }
 0x1d3   :  { %1153 = vsyncpa [#allocation3], 1 }
 0x1d4   :  { %1155 = vsyncpa [#allocation3 + $0x1], 1 }

</bundles_post_ra>
